<compile_context>
chip_gen: v7x
topology: tpu7x:2x2x1
jax: 0.10.0
libtpu: 0.0.40
codegen_flags: <defaults>
</compile_context>

<pallas_src>
import jax
import jax.numpy as jnp
from jax.experimental import pallas as pl
from jax.experimental.pallas import tpu as pltpu


def _round_up(x: int, m: int) -> int:
    return ((x + m - 1) // m) * m


def _linear_kernel(x_ref, w_ref, b_ref, o_ref):
    # x_ref: (tm, tk) bf16   w_ref: (tk, tn) bf16   b_ref: (1, tn) f32
    # o_ref: (tm, tn) f32 -- same (i, j) block for every k, so it stays
    # resident in VMEM across the K axis and doubles as the accumulator.
    k = pl.program_id(2)
    partial = jnp.dot(x_ref[...], w_ref[...], preferred_element_type=jnp.float32)

    @pl.when(k == 0)
    def _():
        o_ref[...] = partial + b_ref[...]        # bias added exactly once

    @pl.when(k > 0)
    def _():
        o_ref[...] += partial


_TM_MAX = 512   # batch tile (sublane multiple of 8)
_TN_MAX = 512   # output-feature tile (lane multiple of 128)
_TK_MAX = 1024  # reduction tile (lane multiple of 128)


class LinearRegression:
    """Pallas-TPU forward of nn.Linear(input_size, output_size)."""

    def __init__(self, weight, bias):
        # weight: (OUT, IN), bias: (OUT,).  One-time layout work here (not per call).
        self.out_features, self.in_features = weight.shape

        OUTp = _round_up(self.out_features, 128)
        INp = _round_up(self.in_features, 128)
        self.tn = min(_TN_MAX, OUTp)
        self.tk = min(_TK_MAX, INp)
        self.Np = _round_up(OUTp, self.tn)
        self.Kp = _round_up(INp, self.tk)

        wT = jnp.asarray(weight, jnp.float32).T.astype(jnp.bfloat16)   # (IN, OUT)
        self.wT_p = (
            jnp.zeros((self.Kp, self.Np), jnp.bfloat16)
            .at[: self.in_features, : self.out_features]
            .set(wT)
        )
        self.b_p = (
            jnp.zeros((1, self.Np), jnp.float32)
            .at[0, : self.out_features]
            .set(jnp.asarray(bias, jnp.float32))
        )

    def __call__(self, x):
        B, IN = x.shape
        assert IN == self.in_features, (IN, self.in_features)

        tm = min(_TM_MAX, _round_up(B, 8))
        Mp = _round_up(B, tm)
        tn, tk, Np, Kp = self.tn, self.tk, self.Np, self.Kp

        x_bf = jnp.asarray(x, jnp.bfloat16)
        if (Mp, Kp) != (B, IN):                 # pad only when needed
            x_bf = jnp.pad(x_bf, ((0, Mp - B), (0, Kp - IN)))

        grid = (Mp // tm, Np // tn, Kp // tk)

        cost = pl.CostEstimate(
            flops=2 * Mp * Np * Kp,
            transcendentals=0,
            bytes_accessed=Mp * Kp * 2 + Kp * Np * 2 + Mp * Np * 4 + Np * 4,
        )

        out_p = pl.pallas_call(
            _linear_kernel,
            out_shape=jax.ShapeDtypeStruct((Mp, Np), jnp.float32),
            grid=grid,
            in_specs=[
                pl.BlockSpec((tm, tk), lambda i, j, k: (i, k)),   # x tile
                pl.BlockSpec((tk, tn), lambda i, j, k: (k, j)),   # W^T tile
                pl.BlockSpec((1, tn), lambda i, j, k: (0, j)),    # bias tile
            ],
            out_specs=pl.BlockSpec((tm, tn), lambda i, j, k: (i, j)),
            compiler_params=pltpu.CompilerParams(
                dimension_semantics=("parallel", "parallel", "arbitrary"),
            ),
            cost_estimate=cost,
        )(x_bf, self.wT_p, self.b_p)

        if (Mp, Np) != (B, self.out_features):
            out_p = out_p[:B, : self.out_features]
        return out_p


def _reference(x, weight, bias):
    return jnp.dot(x, weight.T, precision=jax.lax.Precision.HIGHEST) + bias


if __name__ == "__main__":
    # ---- Toy shapes from the lab script: linear_regression(4, 1), X is (2, 4) ----
    input_size, output_size = 4, 1

    key = jax.random.PRNGKey(0)
    kw, kb, kx2, kw2, kb2 = jax.random.split(key, 5)

    # nn.Linear default init: U(-1/sqrt(in_features), 1/sqrt(in_features))
    bound = 1.0 / jnp.sqrt(jnp.float32(input_size))
    weight = jax.random.uniform(
        kw, (output_size, input_size), dtype=jnp.float32, minval=-bound, maxval=bound
    )
    bias = jax.random.uniform(
        kb, (output_size,), dtype=jnp.float32, minval=-bound, maxval=bound
    )

    model = LinearRegression(weight, bias)

    X = jnp.array(
        [[11.0, 12.0, 13.0, 14.0], [11.0, 12.0, 13.0, 14.0]], dtype=jnp.float32
    )

    # NOTE: at these toy shapes the kernel is pure launch overhead vs. plain XLA;
    # the tiling only pays off at multi-MB operand sizes (exercised below).
    yhat = jax.block_until_ready(model(X))
    ref = _reference(X, weight, bias)
    assert yhat.shape == (2, 1), yhat.shape
    # bf16 MXU operands vs. f32 HIGHEST reference -> loose tolerance.
    assert jnp.allclose(yhat, ref, rtol=2e-2, atol=2e-2), (yhat, ref)

    # ---- Secondary check: exercises K accumulation (2 K steps) + non-trivial tiles ----
    B2, IN2, OUT2 = 272, 2048, 384
    x2 = jax.random.normal(kx2, (B2, IN2), dtype=jnp.float32)
    w2 = jax.random.normal(kw2, (OUT2, IN2), dtype=jnp.float32) * 0.02
    b2 = jax.random.normal(kb2, (OUT2,), dtype=jnp.float32)

    model2 = LinearRegression(w2, b2)
    y2 = jax.block_until_ready(model2(x2))
    ref2 = _reference(x2, w2, b2)
    assert y2.shape == (B2, OUT2), y2.shape
    assert jnp.allclose(y2, ref2, rtol=2e-2, atol=5e-2), float(
        jnp.max(jnp.abs(y2 - ref2))
    )

    print("KERNEL_OK")
</pallas_src>

<mosaic_0001>
module attributes {stable_mosaic.version = 11 : i64} {
  func.func @_linear_kernel(%arg0: i32, %arg1: i32, %arg2: i32, %arg3: memref<8x128xbf16, #tpu.memory_space<vmem>>, %arg4: memref<128x128xbf16, #tpu.memory_space<vmem>>, %arg5: memref<1x128xf32, #tpu.memory_space<vmem>>, %arg6: memref<8x128xf32, #tpu.memory_space<vmem>>) attributes {dimension_semantics = [#tpu.dimension_semantics<parallel>, #tpu.dimension_semantics<parallel>, #tpu.dimension_semantics<arbitrary>], iteration_bounds = array<i64: 1, 1, 1>, scalar_prefetch = 0 : i64, scratch_operands = 0 : i64, tpu.core_type = #tpu.core_type<tc>, window_params = [{transform_indices = @transform_0, window_bounds = array<i64: 8, 128>}, {transform_indices = @transform_1, window_bounds = array<i64: 128, 128>}, {transform_indices = @transform_2, window_bounds = array<i64: 1, 128>}, {transform_indices = @transform_3, window_bounds = array<i64: 8, 128>}]} {
    %c0 = arith.constant 0 : index
    %c0_0 = arith.constant 0 : index
    %0 = vector.load %arg3[%c0, %c0_0] : memref<8x128xbf16, #tpu.memory_space<vmem>>, vector<8x128xbf16>
    %c0_1 = arith.constant 0 : index
    %c0_2 = arith.constant 0 : index
    %1 = vector.load %arg4[%c0_1, %c0_2] : memref<128x128xbf16, #tpu.memory_space<vmem>>, vector<128x128xbf16>
    %cst = arith.constant dense<0.000000e+00> : vector<8x128xf32>
    %2 = tpu.matmul %0, %1, %cst {dimension_numbers = #tpu.dot_dimension_numbers<[1], [0], [0], [1], [0, 0, 1, 1], [], []>} : vector<8x128xbf16>, vector<128x128xbf16>, vector<8x128xf32> -> vector<8x128xf32>
    %c0_i32 = arith.constant 0 : i32
    %3 = arith.cmpi eq, %arg2, %c0_i32 : i32
    %4 = arith.extui %3 : i1 to i32
    %c0_i32_3 = arith.constant 0 : i32
    %5 = arith.cmpi ne, %4, %c0_i32_3 : i32
    scf.if %5 {
      %c0_6 = arith.constant 0 : index
      %c0_7 = arith.constant 0 : index
      %9 = vector.load %arg5[%c0_6, %c0_7] : memref<1x128xf32, #tpu.memory_space<vmem>>, vector<1x128xf32>
      %10 = vector.broadcast %9 : vector<1x128xf32> to vector<8x128xf32>
      %11 = arith.addf %2, %10 : vector<8x128xf32>
      %c0_8 = arith.constant 0 : index
      %c0_9 = arith.constant 0 : index
      %12 = vector.load %arg6[%c0_8, %c0_9] : memref<8x128xf32, #tpu.memory_space<vmem>>, vector<8x128xf32>
      tpu.vector_store %arg6[%c0_8, %c0_9], %11 {strides = array<i32>} : memref<8x128xf32, #tpu.memory_space<vmem>>, vector<8x128xf32>,
    } else {
    }
    %c0_i32_4 = arith.constant 0 : i32
    %6 = arith.cmpi sgt, %arg2, %c0_i32_4 : i32
    %7 = arith.extui %6 : i1 to i32
    %c0_i32_5 = arith.constant 0 : i32
    %8 = arith.cmpi ne, %7, %c0_i32_5 : i32
    scf.if %8 {
      %c0_6 = arith.constant 0 : index
      %c0_7 = arith.constant 0 : index
      %9 = vector.load %arg6[%c0_6, %c0_7] : memref<8x128xf32, #tpu.memory_space<vmem>>, vector<8x128xf32>
      %10 = arith.addf %9, %2 : vector<8x128xf32>
      %c0_8 = arith.constant 0 : index
      %c0_9 = arith.constant 0 : index
      %11 = vector.load %arg6[%c0_8, %c0_9] : memref<8x128xf32, #tpu.memory_space<vmem>>, vector<8x128xf32>
      tpu.vector_store %arg6[%c0_8, %c0_9], %10 {strides = array<i32>} : memref<8x128xf32, #tpu.memory_space<vmem>>, vector<8x128xf32>,
    } else {
    }
    return
  }
  func.func @transform_0(%arg0: i32, %arg1: i32, %arg2: i32) -> (i32, i32) {
    %c0_i32 = arith.constant 0 : i32
    return %arg0, %arg2 : i32, i32
  }
  func.func @transform_1(%arg0: i32, %arg1: i32, %arg2: i32) -> (i32, i32) {
    %c0_i32 = arith.constant 0 : i32
    return %arg2, %arg1 : i32, i32
  }
  func.func @transform_2(%arg0: i32, %arg1: i32, %arg2: i32) -> (i32, i32) {
    %c0_i32 = arith.constant 0 : i32
    %c0_i32_0 = arith.constant 0 : i32
    return %c0_i32, %arg1 : i32, i32
  }
  func.func @transform_3(%arg0: i32, %arg1: i32, %arg2: i32) -> (i32, i32) {
    %c0_i32 = arith.constant 0 : i32
    return %arg0, %arg1 : i32, i32
  }
}

</mosaic_0001>

<bundles_post_ra>
// kernel: tpu_custom_call.1
= control target key start
LH: loop header
LB: loop body
LE: loop exit
PB: predicated region body
PF: predicated region fallthrough
CT: control target
= control target key end

     0   :  { %8 = vsyncpa [#allocation3], 0  ;;  %s381_s0 = inlined_call_operand.hbm [shape: bf16[8,128], index: 0, kind: input, shape index: {}]   ;;  %s382_s1 = inlined_call_operand.hbm [shape: bf16[128,128], index: 1, kind: input, shape index: {}]   ;;  %s383_s2 = inlined_call_operand.vmem [shape: f32[1,128], index: 2, kind: input, shape index: {}]   ;;  %s384_s3 = inlined_call_operand.hbm [shape: f32[8,128], index: 3, kind: output, shape index: {}]  }
   0x1   :  { %9 = vsyncpa [#allocation6], 0 }
   0x2   :  { %10 = vsyncpa [#allocation4], 0  ;;  %s308_s12 = smov [#allocation2]   ;;  %s309_s14 = smov [#allocation5]  }
   0x3   :  { %s17_s13 = sshll.u32 %s308_s12, 4  ;;  %s26_s15 = sshll.u32 %s309_s14, 4  ;;  %s18_s13 = int_to_ptr.vmem [resolvable:$true] %s17_s13  ;;  %s335_s15 = int_to_ptr.vmem [resolvable:$true] %s26_s15 }
   0x4   :  { %s236_s18 = scalar_lea.hbm %s381_s0, 64 }
   0x5   :  { %p237_p0 = scmp.ne.s32.totalorder %s381_s0, %s236_s18  ;;  %p240_p1 = scmp.lt.u32.totalorder %s236_s18, %s381_s0 }
   0x7   :  { %p242_p2 = pnand %p240_p1, %p237_p0 }
   0x9   :  { %245 = shalt.err (!%p242_p2)
}
   0xa   :  { %s246_s23 = scalar_lea.vmem %s18_s13, 64  ;;  %p251_p4 = scmp.lt.s32.totalorder %s18_s13, %s18_s13 }
   0xb   :  { %p247_p3 = scmp.ne.s32.totalorder %s18_s13, %s246_s23  ;;  %p252_p5 = scmp.lt.s32.totalorder %s246_s23, %s246_s23 }
   0xd   :  { %p253_p6 = por %p252_p5, %p251_p4 }
   0xf   :  { %p254_p7 = pnand %p253_p6, %p247_p3 }
  0x11   :  { %257 = shalt.err (!%p254_p7)
}
  0x12   :  { %20 = dma.hbm_to_vmem [thread:$0]  %s381_s0, 64, %s18_s13, [#allocation3]  }
  0x13   :  { %s258_s28 = scalar_lea.hbm %s382_s1, 1024 }
  0x14   :  { %p259_p8 = scmp.ne.s32.totalorder %s382_s1, %s258_s28  ;;  %p262_p9 = scmp.lt.u32.totalorder %s258_s28, %s382_s1 }
  0x16   :  { %p264_p10 = pnand %p262_p9, %p259_p8 }
  0x18   :  { %267 = shalt.err (!%p264_p10)
}
  0x19   :  { %s268_s6 = scalar_lea.vmem %s335_s15, 1024  ;;  %p273_p12 = scmp.lt.s32.totalorder %s335_s15, %s335_s15 }
  0x1a   :  { %p269_p11 = scmp.ne.s32.totalorder %s335_s15, %s268_s6  ;;  %p274_p13 = scmp.lt.s32.totalorder %s268_s6, %s268_s6 }
  0x1c   :  { %p275_p0 = por %p274_p13, %p273_p12 }
  0x1e   :  { %p276_p1 = pnand %p275_p0, %p269_p11 }
  0x20   :  { %279 = shalt.err (!%p276_p1)
}
  0x21   :  { %s310_s0 = smov 64   ;;  %s311_s7 = smov 4  }
  0x22   :  { %32 = dma.hbm_to_vmem [thread:$0]  %s382_s1, 1024, %s335_s15, [#allocation6], %s310_s0, %s310_s0, %s311_s7  }
  0x23   :  { %302 = dma.done.wait [#allocation3], 64  }
  0x24   :  { %303 = vsyncadd [#allocation3], 4294967232 }
  0x25   :  { %304 = dma.done.wait [#allocation6], 1024  }
  0x26   :  { %305 = vsyncadd [#allocation6], 4294966272  ;;  %v312_v0 = vmov 0.0   ;;  %vm313_vm0 = vmmov 0   ;;  %v228_v1 = vld [vmem:[#allocation5] sm:$0xff]   ;;  %v229_v2 = vld [vmem:[#allocation5 + $0x8] sm:$0xff]  }
  0x27   :  { %201 = vmatprep.subr.bf16.mxu0 %v312_v0  ;;  %217 = vmatprep.mubr.msk.bf16.mxu0 %vm313_vm0, %v312_v0  ;;  %v230_v3 = vld [vmem:[#allocation5 + $0x10] sm:$0xff]   ;;  %v231_v4 = vld [vmem:[#allocation5 + $0x18] sm:$0xff]   ;;  %v232_v5 = vld [vmem:[#allocation5 + $0x20] sm:$0xff]   ;;  %s314_s11 = smov [#allocation7]  }
  0x28   :  { %202 = vmatpush3.bf16.msra.mxu0 %v228_v1  ;;  %v233_v6 = vld [vmem:[#allocation5 + $0x28] sm:$0xff]   ;;  %v234_v7 = vld [vmem:[#allocation5 + $0x30] sm:$0xff]   ;;  %v235_v8 = vld [vmem:[#allocation5 + $0x38] sm:$0xff]   ;;  %s173_s12 = sshll.u32 %s314_s11, 4  ;;  %s174_s12 = int_to_ptr.vmem [resolvable:$true] %s173_s12 }
  0x29   :  { %203 = vmatprep.subr.bf16.mxu0 %v312_v0  ;;  %v42_v9 = vld [vmem:[#allocation2] sm:$0xf]  ;;  %s280_s13 = scalar_lea.vmem %s174_s12, 128  ;;  %p285_p3 = scmp.lt.s32.totalorder %s174_s12, %s174_s12 }
  0x2a   :  { %v191_v10 = vld [vmem:[%s383_s2] ss:$0 sm:$0xff]  ;;  %p281_p2 = scmp.ne.s32.totalorder %s174_s12, %s280_s13  ;;  %p286_p4 = scmp.lt.s32.totalorder %s280_s13, %s280_s13 }
  0x2c   :  { %204 = vmatpush3.bf16.msra.mxu0 %v229_v2  ;;  %p287_p5 = por %p286_p4, %p285_p3 }
  0x2d   :  { %205 = vmatprep.subr.bf16.mxu0 %v312_v0 }
  0x2e   :  { %p288_p6 = pnand %p287_p5, %p281_p2 }
  0x30   :  { %206 = vmatpush3.bf16.msra.mxu0 %v230_v3 }
  0x31   :  { %207 = vmatprep.subr.bf16.mxu0 %v312_v0 }
  0x34   :  { %208 = vmatpush3.bf16.msra.mxu0 %v231_v4 }
  0x35   :  { %209 = vmatprep.subr.bf16.mxu0 %v312_v0 }
  0x38   :  { %210 = vmatpush3.bf16.msra.mxu0 %v232_v5 }
  0x39   :  { %211 = vmatprep.subr.bf16.mxu0 %v312_v0 }
  0x3c   :  { %212 = vmatpush3.bf16.msra.mxu0 %v233_v6 }
  0x3d   :  { %213 = vmatprep.subr.bf16.mxu0 %v312_v0 }
  0x40   :  { %214 = vmatpush3.bf16.msra.mxu0 %v234_v7 }
  0x41   :  { %215 = vmatprep.subr.bf16.mxu0 %v312_v0 }
  0x44   :  { %216 = vmatpush3.bf16.msra.mxu0 %v235_v8 }
  0x47   :  { %218 = vmatmul.mubr.bf16.vlgmr.msra.gmra.mrb[0].mxu0 %v42_v9 }
 0x11a   :  { %v141_v11 = vpop.f32.mrb[0].mxu0 }
 0x11b   :  { %v158_v12 = vadd.f32 %v191_v10, %v141_v11  ;;  %v219_v13 = vpop.f32.mrb[1].mxu0 }
 0x11c   :  { %v144_v14 = vpop.f32.mrb[2].mxu0 }
 0x11d   :  { %159 = vst [vmem:[#allocation7] sm:$0xff] %v158_v12  ;;  %v220_v15 = vpop.f32.mrb[3].mxu0 }
 0x11e   :  { %291 = shalt.err (!%p288_p6)
}
 0x11f   :  { %s292_s2 = scalar_lea.hbm %s384_s3, 128 }
 0x120   :  { %p293_p7 = scmp.ne.s32.totalorder %s384_s3, %s292_s2  ;;  %p296_p8 = scmp.lt.u32.totalorder %s292_s2, %s384_s3 }
 0x122   :  { %p298_p9 = pnand %p296_p8, %p293_p7 }
 0x124   :  { %301 = shalt.err (!%p298_p9)
}
 0x125   :  { %176 = dma.vmem_to_hbm [thread:$0]  %s174_s12, 128, %s384_s3, [#allocation4]  }
 0x126   :  { %306 = dma.done.wait [#allocation4], 128  }
 0x127   :  { %307 = vsyncadd [#allocation4], 4294967168 }
 0x128   :  { %180 = vsyncpa [#allocation3], 1 }
 0x129   :  { %181 = vsyncpa [#allocation6], 1 }
 0x12a   :  { %182 = vsyncpa [#allocation4], 1 }

</bundles_post_ra>
